<compile_context>
chip_gen: v6e
topology: v6e:2x2x1
jax: 0.10.0
libtpu: 0.0.40
codegen_flags: <defaults>
</compile_context>

<pallas_src>
import functools

import jax
import jax.numpy as jnp
from jax.experimental import pallas as pl
from jax.experimental.pallas import tpu as pltpu

LANE = 128  # TPU vreg lane width


def _cdiv(a, b):
    return -(-a // b)


def _round_up(a, m):
    return _cdiv(a, m) * m


def classifier_kernel(x_ref, w1c_ref, b1c_ref, wcomb_ref, bcomb_ref,
                      onehot_ref, out_ref, *, hidden):
    x = x_ref[...]                                             # (TB, H) f32

    # --- fused base_model layer-1 + inv_temperature head (MXU push #1) ---
    # w1c lanes 0..H-1 hold w1, lane H holds wt (rest zero).
    out1 = jnp.dot(x, w1c_ref[...],
                   preferred_element_type=jnp.float32) + b1c_ref[...]

    z = out1[:, hidden:hidden + 1]                             # (TB, 1) pre-softplus
    # numerically-stable softplus: max(z,0) + log1p(exp(-|z|))
    beta = jnp.maximum(z, 0.0) + jnp.log1p(jnp.exp(-jnp.abs(z)))

    a = jnp.maximum(out1, 0.0)                                 # ReLU whole slab; lanes
                                                               # >= H are killed by the
                                                               # zero rows of wcomb.

    # --- folded (layer-2 @ predictions) head (MXU push #2) ---------------
    y = jnp.dot(a, wcomb_ref[...],
                preferred_element_type=jnp.float32) + bcomb_ref[...]

    # lanes 0..L-1 = beta*y, lane L = beta (one-hot), rest zero.
    out_ref[...] = (beta * (y + onehot_ref[...])).astype(out_ref.dtype)


def _pack_params(p, hidden, n_labels, out_w):
    """Fold heads into two lane-padded weights + a one-hot beta-lane mask."""
    f32 = jnp.float32
    w1c = jnp.zeros((hidden, LANE), f32)
    w1c = w1c.at[:, :hidden].set(p["w1"]).at[:, hidden:hidden + 1].set(p["wt"])
    b1c = jnp.zeros((1, LANE), f32)
    b1c = b1c.at[:, :hidden].set(p["b1"]).at[:, hidden:hidden + 1].set(p["bt"])

    # Exact algebra: no nonlinearity between layer-2 and the predictions head.
    w2wp = jnp.dot(p["w2"], p["wp"])                 # (H, L)
    b2wp = jnp.dot(p["b2"], p["wp"]) + p["bp"]       # (1, L)
    wcomb = jnp.zeros((LANE, out_w), f32).at[:hidden, :n_labels].set(w2wp)
    bcomb = jnp.zeros((1, out_w), f32).at[:, :n_labels].set(b2wp)

    onehot = jnp.zeros((1, out_w), f32).at[:, n_labels].set(1.0)
    return w1c, b1c, wcomb, bcomb, onehot


def _choose_tiling(B, batch_tile, tb_cap):
    """Pick (tile_rows, padded_B, n_tiles). n_tiles >= 2 and even so both
    v7x TensorCores get balanced work; tile_rows is a multiple of 8."""
    cap = max(8, (min(batch_tile, tb_cap) // 8) * 8)
    n = max(2, _cdiv(B, cap))
    n += n % 2                               # even => balanced across 2 TCs
    tb = max(8, _round_up(_cdiv(B, n), 8))   # guaranteed <= cap
    return tb, n * tb, n


def classifier_forward(x, params, *, batch_tile=1024, out_lanes=LANE,
                       vmem_limit_bytes=32 * 1024 * 1024):
    B, H = x.shape
    L = params["wp"].shape[1]
    assert H + 1 <= LANE, "hidden must be <= 127 (wt is folded into lane H of layer-1)"
    assert L + 1 <= out_lanes <= LANE, "need n_labels < out_lanes <= 128"

    # VMEM budget: weights (double-buffered) + per-row double-buffered x/out.
    weight_bytes = 4 * (H * LANE + LANE + LANE * out_lanes + 2 * out_lanes)
    per_row_bytes = 2 * 4 * (H + out_lanes)
    budget = vmem_limit_bytes // 2 - 2 * weight_bytes   # keep 2x headroom
    tb_cap = max(8, budget // per_row_bytes)

    tb, Bp, n_tiles = _choose_tiling(B, batch_tile, tb_cap)
    xp = jnp.pad(x, ((0, Bp - B), (0, 0))) if Bp != B else x

    w1c, b1c, wcomb, bcomb, onehot = _pack_params(params, H, L, out_lanes)

    kernel = functools.partial(classifier_kernel, hidden=H)

    # Two matmuls per row: (H x 128) and (128 x out_lanes); 2 transcendentals/row.
    flops = 2 * Bp * (H * LANE + LANE * out_lanes)
    bytes_accessed = 4 * (xp.size + Bp * out_lanes) + weight_bytes
    cost = pl.CostEstimate(flops=flops, transcendentals=2 * Bp,
                           bytes_accessed=bytes_accessed)

    slab = pl.pallas_call(
        kernel,
        out_shape=jax.ShapeDtypeStruct((Bp, out_lanes), jnp.float32),
        grid_spec=pltpu.PrefetchScalarGridSpec(
            num_scalar_prefetch=0,
            grid=(n_tiles,),
            in_specs=[
                pl.BlockSpec((tb, H), lambda i: (i, 0)),            # x batch tile
                pl.BlockSpec((H, LANE), lambda i: (0, 0)),          # fused w1 | wt
                pl.BlockSpec((1, LANE), lambda i: (0, 0)),          # fused b1 | bt
                pl.BlockSpec((LANE, out_lanes), lambda i: (0, 0)),  # folded w2 @ wp
                pl.BlockSpec((1, out_lanes), lambda i: (0, 0)),     # folded b2@wp + bp
                pl.BlockSpec((1, out_lanes), lambda i: (0, 0)),     # one-hot beta lane
            ],
            out_specs=pl.BlockSpec((tb, out_lanes), lambda i: (i, 0)),
        ),
        compiler_params=pltpu.CompilerParams(
            dimension_semantics=("parallel",),       # batch shards across v7x TCs
            vmem_limit_bytes=vmem_limit_bytes),
        cost_estimate=cost,
    )(xp, w1c, b1c, wcomb, bcomb, onehot)

    return slab[:B, :L], slab[:B, L:L + 1]


def init_params(key, hidden, n_labels):
    ks = jax.random.split(key, 8)
    scale = 0.1
    return {
        # base_model (2-layer MLP). Biases kept 2-D (1, out) for clean TPU layout.
        "w1": scale * jax.random.normal(ks[0], (hidden, hidden), jnp.float32),
        "b1": scale * jax.random.normal(ks[1], (1, hidden), jnp.float32),
        "w2": scale * jax.random.normal(ks[2], (hidden, hidden), jnp.float32),
        "b2": scale * jax.random.normal(ks[3], (1, hidden), jnp.float32),
        # predictions head
        "wp": scale * jax.random.normal(ks[4], (hidden, n_labels), jnp.float32),
        "bp": scale * jax.random.normal(ks[5], (1, n_labels), jnp.float32),
        # inv_temperature head
        "wt": scale * jax.random.normal(ks[6], (hidden, 1), jnp.float32),
        "bt": scale * jax.random.normal(ks[7], (1, 1), jnp.float32),
    }


def reference_forward(x, p):
    h = jnp.maximum(x @ p["w1"] + p["b1"], 0.0)
    features = h @ p["w2"] + p["b2"]
    y = features @ p["wp"] + p["bp"]
    beta = jax.nn.softplus(x @ p["wt"] + p["bt"])
    return beta * y, beta


if __name__ == "__main__":
    B, H, L = 64, 32, 10
    key = jax.random.PRNGKey(0)
    k_x, k_p = jax.random.split(key)
    x = jax.random.normal(k_x, (B, H), jnp.float32)
    params = init_params(k_p, H, L)

    ref_y, ref_beta = reference_forward(x, params)

    # Default: lane-dense 128-wide output slab (unmasked stores; v6e/v7x).
    scaled_y, beta = classifier_forward(x, params)
    scaled_y = jax.block_until_ready(scaled_y)
    beta = jax.block_until_ready(beta)
    assert scaled_y.shape == (B, L) and beta.shape == (B, 1)
    assert jnp.allclose(scaled_y, ref_y, atol=1e-5, rtol=1e-5)
    assert jnp.allclose(beta, ref_beta, atol=1e-5, rtol=1e-5)

    # Narrow 16-lane output slab (v5e writeback-traffic option).
    y16, b16 = classifier_forward(x, params, out_lanes=16)
    y16 = jax.block_until_ready(y16)
    b16 = jax.block_until_ready(b16)
    assert jnp.allclose(y16, ref_y, atol=1e-5, rtol=1e-5)
    assert jnp.allclose(b16, ref_beta, atol=1e-5, rtol=1e-5)

    # TODO(synk): the is_temp=False branch returns torch.ones() (an invalid call
    # in the reference); only the is_temp=True path is implemented here.
    print("KERNEL_OK")
</pallas_src>

<mosaic_0001>
module attributes {stable_mosaic.version = 11 : i64} {
  func.func @classifier_kernel(%arg0: i32, %arg1: memref<32x32xf32, #tpu.memory_space<vmem>>, %arg2: memref<32x128xf32, #tpu.memory_space<vmem>>, %arg3: memref<1x128xf32, #tpu.memory_space<vmem>>, %arg4: memref<128x128xf32, #tpu.memory_space<vmem>>, %arg5: memref<1x128xf32, #tpu.memory_space<vmem>>, %arg6: memref<1x128xf32, #tpu.memory_space<vmem>>, %arg7: memref<32x128xf32, #tpu.memory_space<vmem>>) attributes {dimension_semantics = [#tpu.dimension_semantics<parallel>], iteration_bounds = array<i64: 2>, scalar_prefetch = 0 : i64, scratch_operands = 0 : i64, tpu.core_type = #tpu.core_type<tc>, window_params = [{transform_indices = @transform_0, window_bounds = array<i64: 32, 32>}, {pipeline_mode = #tpu.pipeline_mode<synchronous>, transform_indices = @transform_1, window_bounds = array<i64: 32, 128>}, {pipeline_mode = #tpu.pipeline_mode<synchronous>, transform_indices = @transform_2, window_bounds = array<i64: 1, 128>}, {pipeline_mode = #tpu.pipeline_mode<synchronous>, transform_indices = @transform_3, window_bounds = array<i64: 128, 128>}, {pipeline_mode = #tpu.pipeline_mode<synchronous>, transform_indices = @transform_4, window_bounds = array<i64: 1, 128>}, {pipeline_mode = #tpu.pipeline_mode<synchronous>, transform_indices = @transform_5, window_bounds = array<i64: 1, 128>}, {transform_indices = @transform_6, window_bounds = array<i64: 32, 128>}]} {
    %c0 = arith.constant 0 : index
    %c0_0 = arith.constant 0 : index
    %0 = vector.load %arg1[%c0, %c0_0] : memref<32x32xf32, #tpu.memory_space<vmem>>, vector<32x32xf32>
    %c0_1 = arith.constant 0 : index
    %c0_2 = arith.constant 0 : index
    %1 = vector.load %arg2[%c0_1, %c0_2] : memref<32x128xf32, #tpu.memory_space<vmem>>, vector<32x128xf32>
    %cst = arith.constant dense<0.000000e+00> : vector<32x128xf32>
    %2 = tpu.matmul %0, %1, %cst {dimension_numbers = #tpu.dot_dimension_numbers<[1], [0], [0], [1], [0, 0, 1, 1], [], []>} : vector<32x32xf32>, vector<32x128xf32>, vector<32x128xf32> -> vector<32x128xf32>
    %c0_3 = arith.constant 0 : index
    %c0_4 = arith.constant 0 : index
    %3 = vector.load %arg3[%c0_3, %c0_4] : memref<1x128xf32, #tpu.memory_space<vmem>>, vector<1x128xf32>
    %4 = vector.broadcast %3 : vector<1x128xf32> to vector<32x128xf32>
    %5 = arith.addf %2, %4 : vector<32x128xf32>
    %6 = vector.extract_strided_slice %5 {offsets = [0, 32], sizes = [32, 1], strides = [1, 1]} : vector<32x128xf32> to vector<32x1xf32>
    %cst_5 = arith.constant 0.000000e+00 : f32
    %7 = vector.broadcast %cst_5 : f32 to vector<32x1xf32>
    %8 = arith.maximumf %6, %7 : vector<32x1xf32>
    %9 = math.absf %6 : vector<32x1xf32>
    %cst_6 = arith.constant 0.000000e+00 : f32
    %10 = vector.broadcast %cst_6 : f32 to vector<32x1xf32>
    %11 = arith.subf %10, %9 : vector<32x1xf32>
    %12 = math.exp %11 : vector<32x1xf32>
    %13 = math.log1p %12 : vector<32x1xf32>
    %14 = arith.addf %8, %13 : vector<32x1xf32>
    %cst_7 = arith.constant 0.000000e+00 : f32
    %15 = vector.broadcast %cst_7 : f32 to vector<32x128xf32>
    %16 = arith.maximumf %5, %15 : vector<32x128xf32>
    %c0_8 = arith.constant 0 : index
    %c0_9 = arith.constant 0 : index
    %17 = vector.load %arg4[%c0_8, %c0_9] : memref<128x128xf32, #tpu.memory_space<vmem>>, vector<128x128xf32>
    %cst_10 = arith.constant dense<0.000000e+00> : vector<32x128xf32>
    %18 = tpu.matmul %16, %17, %cst_10 {dimension_numbers = #tpu.dot_dimension_numbers<[1], [0], [0], [1], [0, 0, 1, 1], [], []>} : vector<32x128xf32>, vector<128x128xf32>, vector<32x128xf32> -> vector<32x128xf32>
    %c0_11 = arith.constant 0 : index
    %c0_12 = arith.constant 0 : index
    %19 = vector.load %arg5[%c0_11, %c0_12] : memref<1x128xf32, #tpu.memory_space<vmem>>, vector<1x128xf32>
    %20 = vector.broadcast %19 : vector<1x128xf32> to vector<32x128xf32>
    %21 = arith.addf %18, %20 : vector<32x128xf32>
    %c0_13 = arith.constant 0 : index
    %c0_14 = arith.constant 0 : index
    %22 = vector.load %arg6[%c0_13, %c0_14] : memref<1x128xf32, #tpu.memory_space<vmem>>, vector<1x128xf32>
    %23 = vector.broadcast %22 : vector<1x128xf32> to vector<32x128xf32>
    %24 = arith.addf %21, %23 : vector<32x128xf32>
    %25 = vector.broadcast %14 : vector<32x1xf32> to vector<32x128xf32>
    %26 = arith.mulf %25, %24 : vector<32x128xf32>
    %c0_15 = arith.constant 0 : index
    %c0_16 = arith.constant 0 : index
    %27 = vector.load %arg7[%c0_15, %c0_16] : memref<32x128xf32, #tpu.memory_space<vmem>>, vector<32x128xf32>
    tpu.vector_store %arg7[%c0_15, %c0_16], %26 {strides = array<i32>} : memref<32x128xf32, #tpu.memory_space<vmem>>, vector<32x128xf32>,
    return
  }
  func.func @transform_0(%arg0: i32) -> (i32, i32) {
    %c0_i32 = arith.constant 0 : i32
    %c0_i32_0 = arith.constant 0 : i32
    return %arg0, %c0_i32 : i32, i32
  }
  func.func @transform_1(%arg0: i32) -> (i32, i32) {
    %c0_i32 = arith.constant 0 : i32
    %c0_i32_0 = arith.constant 0 : i32
    %c0_i32_1 = arith.constant 0 : i32
    return %c0_i32, %c0_i32_0 : i32, i32
  }
  func.func @transform_2(%arg0: i32) -> (i32, i32) {
    %c0_i32 = arith.constant 0 : i32
    %c0_i32_0 = arith.constant 0 : i32
    %c0_i32_1 = arith.constant 0 : i32
    return %c0_i32, %c0_i32_0 : i32, i32
  }
  func.func @transform_3(%arg0: i32) -> (i32, i32) {
    %c0_i32 = arith.constant 0 : i32
    %c0_i32_0 = arith.constant 0 : i32
    %c0_i32_1 = arith.constant 0 : i32
    return %c0_i32, %c0_i32_0 : i32, i32
  }
  func.func @transform_4(%arg0: i32) -> (i32, i32) {
    %c0_i32 = arith.constant 0 : i32
    %c0_i32_0 = arith.constant 0 : i32
    %c0_i32_1 = arith.constant 0 : i32
    return %c0_i32, %c0_i32_0 : i32, i32
  }
  func.func @transform_5(%arg0: i32) -> (i32, i32) {
    %c0_i32 = arith.constant 0 : i32
    %c0_i32_0 = arith.constant 0 : i32
    %c0_i32_1 = arith.constant 0 : i32
    return %c0_i32, %c0_i32_0 : i32, i32
  }
  func.func @transform_6(%arg0: i32) -> (i32, i32) {
    %c0_i32 = arith.constant 0 : i32
    %c0_i32_0 = arith.constant 0 : i32
    return %arg0, %c0_i32 : i32, i32
  }
}

</mosaic_0001>

<bundles_post_ra>
// kernel: tpu_custom_call.1
= control target key start
LH: loop header
LB: loop body
LE: loop exit
PB: predicated region body
PF: predicated region fallthrough
CT: control target
= control target key end

     0   :  { %11 = vsyncpa [#allocation3], 0  ;;  %s1151_s0 = inlined_call_operand.vmem [shape: f32[64,32], index: 0, kind: input, shape index: {}]   ;;  %s1152_s1 = inlined_call_operand.vmem [shape: f32[32,128], index: 1, kind: input, shape index: {}]   ;;  %s1153_s2 = inlined_call_operand.vmem [shape: f32[1,128], index: 2, kind: input, shape index: {}]   ;;  %s1154_s3 = inlined_call_operand.hbm [shape: f32[128,128], index: 3, kind: input, shape index: {}]   ;;  %s1155_s4 = inlined_call_operand.vmem [shape: f32[1,128], index: 4, kind: input, shape index: {}]   ;;  %s1156_s5 = inlined_call_operand.vmem [shape: f32[1,128], index: 5, kind: input, shape index: {}]   ;;  %s1157_s6 = inlined_call_operand.hbm [shape: f32[64,128], index: 6, kind: output, shape index: {}]  }
   0x1   :  { %12 = vsyncpa [#allocation4], 0 }
   0x2   :  { %14 = vsyncpa [#allocation4 + $0x1], 0  ;;  %s985_s21 = smov 0   ;;  %s987_s22 = smov 0  }
   0x3   :  { %s989_s23 = smov 0   ;;  %s991_s24 = smov 0  }
   0x4 LB: > { %s1006_s25 = sadd.s32 4294967295, %s941_s24   ;;  %s676_s26 = sadd.s32 4294967294, %s941_s24   ;;  %s941_s24 = sphi %s991_s24, %s1165_s24   ;;  %s937_s23 = sphi %s989_s23, %s1164_s23   ;;  %s933_s22 = sphi %s987_s22, %s1163_s22   ;;  %s929_s21 = sphi %s985_s21, %s1162_s21  }
   0x5   : > { %s1010_s27 = sadd.s32 1, %s941_s24   ;;  %s158_s28 = sadd.s32 1, %s937_s23 }
   0x6   : > { %s155_s29 = ssub.s32 %s941_s24, %s1010_s27  ;;  %p168_p0 = scmp.ne.s32.totalorder %s937_s23, %s933_s22 }
   0x7   : > { %p156_p1 = scmp.eq.s32.totalorder %s155_s29, 0  ;;  %p169_p2 = scmp.eq.s32.totalorder %s1006_s25, 1 }
   0x8   : > { %p174_p3 = scmp.ne.s32.totalorder %s933_s22, %s929_s21  ;;  %p175_p4 = scmp.eq.s32.totalorder %s676_s26, 1 }
   0x9   : > { %s1021_s30 = scalar_select %p156_p1, %s937_s23, %s158_s28  }
   0xa   : > { %p1023_p5 = por %p169_p2, %p168_p0  ;;  %p1027_p6 = por %p175_p4, %p174_p3 }
   0xb   : > { %p677_p7 = scmp.ge.s32.totalorder %s941_s24, 1  ;;  %p182_p8 = scmp.lt.s32.totalorder %s941_s24, 3 }
   0xc   : > { %s1159_s8 = scalar_select %p1027_p6, 1, 0 }
   0xd   : > { %p792_p9 = scmp.eq.s32.totalorder %s1006_s25, 0  ;;  %p1034_p10 = pnand %p677_p7, %p182_p8 }
   0xe   : > { %s943_s10 = smov [#allocation2]  }
   0xf   : > { %s200_s11 = sshll.u32 %s943_s10, 4  ;;  %p784_p11 = pneg %p1034_p10  ;;  %s201_s11 = int_to_ptr.vmem [resolvable:$true] %s200_s11 }
  0x10   : > { %s862_s12 = scalar_lea.vmem %s201_s11, 2048  ;;  %p870_p3 = scmp.lt.s32.totalorder %s201_s11, %s201_s11 }
  0x11   : > { %p785_p12 = pnand %p792_p9, %p784_p11  ;;  %p863_p0 = scmp.ne.s32.totalorder %s201_s11, %s862_s12 }
  0x12   : > { %p871_p4 = scmp.lt.s32.totalorder %s862_s12, %s862_s12 }
  0x13   : > { %p853_p13 = pneg %p785_p12 }
  0x14   : > { %p872_p6 = por %p871_p4, %p870_p3 }
  0x15   : > { %p865_p1 = pnand %p863_p0, %p853_p13 }
  0x17   : > { %p866_p2 = pneg %p865_p1 }
  0x19   : > { %p873_p7 = pnand %p872_p6, %p866_p2 }
  0x1b   : > { %876 = shalt.err (!%p873_p7)
}
  0x1c   : > { %s944_s13 = smov 128   ;;  %s945_s14 = smov 8  }
  0x1d   : > { %787 = dma.hbm_to_vmem [thread:$0]  (!%p785_p12), %s1154_s3, 2048, %s201_s11, [#allocation3], %s944_s13, %s944_s13, %s945_s14  }
  0x1e   : > { %231 = sbr.rel (%p1034_p10) target bundleno = 464 (0x1d0), region = 44 }
  0x23   : > { %920 = dma.done.wait (%p792_p9), [#allocation3], 2048  }
  0x24   : > { %922 = vsyncadd (%p792_p9), [#allocation3], 4294965248  ;;  %s683_s17 = sshll.u32 %s1006_s25, 2  ;;  %vm283_vm0 = vcmask 261120   ;;  %v275_v0 = vld [vmem:[%s1152_s1 + $0x18] sm:$0xff]  ;;  %v274_v1 = vld [vmem:[%s1152_s1 + $0x10] sm:$0xff] }
  0x25   : > { %p262_p8 = scmp.lt.s32.totalorder %s683_s17, 7  ;;  %726 = vmatprep.subr.mxu0 %v275_v0  ;;  %v273_v3 = vld [vmem:[%s1152_s1 + $0x8] sm:$0xff]  ;;  %v456_v4 = vld [vmem:[#allocation2 + $0x78] sm:$0xff]  ;;  %v455_v5 = vld [vmem:[#allocation2 + $0x70] sm:$0xff]  ;;  %v946_v24 = vmov 32   ;;  %s697_s10 = sshll.u32 %s1006_s25, 9 }
  0x26   : > { %727 = vmatpush3.msra.mxu0 %v275_v0  ;;  %740 = vmatprep.subr.mxu1 %v456_v4  ;;  %v272_v6 = vld [vmem:[%s1152_s1] sm:$0xff]  ;;  %v454_v7 = vld [vmem:[#allocation2 + $0x68] sm:$0xff]  ;;  %v452_v11 = vld [vmem:[#allocation2 + $0x58] sm:$0xff]  ;;  %s1107_s13 = scalar_lea.hbm %s1157_s6, %s697_s10  ;;  %s947_s25 = smov [#allocation5]  }
  0x27   : > { %s1167_s17 = smov (!%p262_p8, %s683_s17), 7  ;;  %728 = vmatprep.subr.mxu0 %v274_v1  ;;  %741 = vmatpush3.msra.mxu1 %v456_v4  ;;  %v453_v9 = vld [vmem:[#allocation2 + $0x60] sm:$0xff]  ;;  %v451_v13 = vld [vmem:[#allocation2 + $0x50] sm:$0xff]  ;;  %v450_v14 = vld [vmem:[#allocation2 + $0x48] sm:$0xff]  ;;  %s881_s16 = sshll.u32 %s947_s25, 4  ;;  %s882_s16 = int_to_ptr.vmem [resolvable:$false] %s881_s16 }
  0x28   : > { %s684_s18 = sshll.u32 %s1167_s17, 3  ;;  %729 = vmatpush3.msra.mxu0 %v274_v1  ;;  %742 = vmatprep.subr.mxu1 %v455_v5  ;;  %v449_v15 = vld [vmem:[#allocation2 + $0x40] sm:$0xff]  ;;  %v448_v16 = vld [vmem:[#allocation2 + $0x38] sm:$0xff]  ;;  %v447_v17 = vld [vmem:[#allocation2 + $0x30] sm:$0xff]  ;;  %s258_s17 = sand.u32 1, %s933_s22  }
  0x29   : > { %s1055_s26 = scalar_lea.vmem %s1151_s0, %s684_s18  ;;  %730 = vmatprep.subr.mxu0 %v273_v3  ;;  %743 = vmatpush3.msra.mxu1 %v455_v5  ;;  %v446_v18 = vld [vmem:[#allocation2 + $0x28] sm:$0xff]  ;;  %v445_v19 = vld [vmem:[#allocation2 + $0x20] sm:$0xff]  ;;  %v444_v20 = vld [vmem:[#allocation2 + $0x18] sm:$0xff]  ;;  %s682_s28 = sshll.u32 %s258_s17, 5 }
  0x2a   : > { %v268_v2 = vld [vmem:[%s1055_s26] sm:$0xff]  ;;  %731 = vmatpush3.msra.mxu0 %v273_v3  ;;  %v269_v8 = vld [vmem:[%s1055_s26 + $0x8] sm:$0xff]  ;;  %v270_v10 = vld [vmem:[%s1055_s26 + $0x10] sm:$0xff]  ;;  %744 = vmatprep.subr.mxu1 %v454_v7  ;;  %s260_s29 = scalar_lea.vmem [#allocation5], %s682_s28  ;;  %s1111_s14 = scalar_lea.sflag [#allocation4], %s258_s17 }
  0x2b   : > { %734 = vmatprep.mubr.msk.f32.mxu0 %vm283_vm0, %v268_v2  ;;  %732 = vmatprep.subr.mxu0 %v272_v6  ;;  %v271_v12 = vld [vmem:[%s1055_s26 + $0x18] sm:$0xff]  ;;  %v443_v21 = vld [vmem:[#allocation2 + $0x10] sm:$0xff]  ;;  %v442_v22 = vld [vmem:[#allocation2 + $0x8] sm:$0xff]  ;;  %s602_s9 = sshll.u32 %s260_s29, 4  ;;  %s883_s18 = scalar_lea.vmem %s882_s16, 1024  ;;  %s1102_s9 = int_to_ptr.vmem [resolvable:$true] %s602_s9 }
  0x2c   : > { %733 = vmatpush3.msra.mxu0 %v272_v6  ;;  %745 = vmatpush3.msra.mxu1 %v454_v7  ;;  %v441_v23 = vld [vmem:[#allocation2] sm:$0xff]  ;;  %s877_s15 = scalar_lea.vmem %s1102_s9, 512  ;;  %p884_p11 = scmp.lt.s32.totalorder %s1102_s9, %s882_s16 }
  0x2d   : > { %735 = vmatmul.mubr.msk.f32.vlgmr.msra.gmra.mxu0 %vm283_vm0, %v269_v8  ;;  %746 = vmatprep.subr.mxu1 %v453_v9  ;;  %v685_v25 = vld [vmem:[%s1153_s2] ss:$0 sm:$0xff]  ;;  %p878_p6 = scmp.ne.s32.totalorder %s1102_s9, %s877_s15  ;;  %p885_p12 = scmp.lt.s32.totalorder %s883_s18, %s877_s15 }
  0x2e   : > { %737 = vmatprep.mubr.msk.f32.mxu0 %vm283_vm0, %v270_v10  ;;  %747 = vmatpush3.msra.mxu1 %v453_v9 }
  0x2f   : > { %748 = vmatprep.subr.mxu1 %v452_v11  ;;  %833 = vset.pattern.permute.xlu0 %v946_v24  ;;  %p879_p9 = pnand %p878_p6, %p1023_p5  ;;  %p886_p13 = por %p885_p12, %p884_p11 }
  0x30   : > { %749 = vmatpush3.msra.mxu1 %v452_v11  ;;  %834 = vset.pattern.permute.xlu1 %v946_v24 }
  0x31   : > { %738 = vmatmul.mubr.msk.f32.gmra.mxu0 %vm283_vm0, %v271_v12  ;;  %750 = vmatprep.subr.mxu1 %v451_v13  ;;  %p880_p10 = pneg %p879_p9 }
  0x32   : > { %751 = vmatpush3.msra.mxu1 %v451_v13 }
  0x33   : > { %752 = vmatprep.subr.mxu1 %v450_v14  ;;  %p887_p0 = pnand %p886_p13, %p880_p10 }
  0x34   : > { %753 = vmatpush3.msra.mxu1 %v450_v14 }
  0x35   : > { %754 = vmatprep.subr.mxu1 %v449_v15 }
  0x36   : > { %755 = vmatpush3.msra.mxu1 %v449_v15 }
  0x37   : > { %756 = vmatprep.subr.mxu1 %v448_v16 }
  0x38   : > { %757 = vmatpush3.msra.mxu1 %v448_v16 }
  0x39   : > { %758 = vmatprep.subr.mxu1 %v447_v17 }
  0x3a   : > { %759 = vmatpush3.msra.mxu1 %v447_v17 }
  0x3b   : > { %760 = vmatprep.subr.mxu1 %v446_v18 }
  0x3c   : > { %761 = vmatpush3.msra.mxu1 %v446_v18 }
  0x3d   : > { %762 = vmatprep.subr.mxu1 %v445_v19 }
  0x3e   : > { %763 = vmatpush3.msra.mxu1 %v445_v19 }
  0x3f   : > { %764 = vmatprep.subr.mxu1 %v444_v20 }
  0x40   : > { %765 = vmatpush3.msra.mxu1 %v444_v20 }
  0x41   : > { %766 = vmatprep.subr.mxu1 %v443_v21 }
  0x42   : > { %767 = vmatpush3.msra.mxu1 %v443_v21 }
  0x43   : > { %768 = vmatprep.subr.mxu1 %v442_v22 }
  0x44   : > { %769 = vmatpush3.msra.mxu1 %v442_v22 }
  0x45   : > { %770 = vmatprep.subr.mxu1 %v441_v23 }
  0x46   : > { %771 = vmatpush3.msra.mxu1 %v441_v23 }
  0xed   : > { %v736_v26 = vpop.f32.mrf.mxu0 }
  0xee   : > { %v1080_v27 = vadd.f32 %v736_v26, %v685_v25 }
  0xef   : > { %v362_v28 = vpop.f32.mrf.mxu0 }
  0xf0   : > { %v386_v29 = vand.u32 2147483647, %v1080_v27  ;;  %v363_v30 = vadd.f32 %v685_v25, %v362_v28  ;;  %v382_v36 = vmax.f32 %v1080_v27, 0.0  ;;  %v690_v28 = vld [vmem:[%s1155_s4] ss:$0 sm:$0xff] }
  0xf1   : > { %v739_v31 = vpop.f32.mrf.mxu0  ;;  %v691_v27 = vld [vmem:[%s1156_s5] ss:$0 sm:$0xff] }
  0xf2   : > { %v390_v32 = vsub.f32 0.0, %v386_v29  ;;  %v385_v33 = vand.u32 2147483647, %v363_v30  ;;  %v1083_v34 = vadd.f32 %v739_v31, %v685_v25  ;;  %v381_v35 = vmax.f32 %v363_v30, 0.0 }
  0xf3   : > { %v372_v37 = vpop.f32.mrf.mxu0 }
  0xf4   : > { %v395_v38 = vmul.f32 1.442695, %v390_v32  ;;  %v389_v39 = vsub.f32 0.0, %v385_v33  ;;  %v388_v40 = vand.u32 2147483647, %v1083_v34  ;;  %772 = vmatprep.mubr.f32.mxu1 %v381_v35  ;;  %v373_v41 = vadd.f32 %v685_v25, %v372_v37 }
  0xf5   : > { %773 = vmatmul.mubr.f32.vlgmr.msra.gmra.mxu1 %v382_v36  ;;  %v384_v46 = vmax.f32 %v1083_v34, 0.0 }
  0xf6   : > { %835 = vpow2.f32 %v395_v38  ;;  %v393_v42 = vmul.f32 1.442695, %v389_v39  ;;  %v392_v43 = vsub.f32 0.0, %v388_v40  ;;  %v383_v44 = vmax.f32 %v373_v41, 0.0 }
  0xf7   : > { %v387_v45 = vand.u32 2147483647, %v373_v41 }
  0xf8   : > { %837 = vpow2.f32 %v393_v42  ;;  %v399_v47 = vmul.f32 1.442695, %v392_v43  ;;  %775 = vmatprep.mubr.f32.mxu1 %v383_v44 }
  0xf9   : > { %v391_v48 = vsub.f32 0.0, %v387_v45  ;;  %776 = vmatmul.mubr.f32.gmra.mxu1 %v384_v46 }
  0xfa   : > { %839 = vpow2.f32 %v399_v47 }
  0xfb   : > { %v397_v49 = vmul.f32 1.442695, %v391_v48 }
  0xfd   : > { %841 = vpow2.f32 %v397_v49 }
 0x103   : > { %v836_v50 = vpop.eup %835 }
 0x104   : > { %v410_v51 = vadd.f32 1.0, %v836_v50  ;;  %v413_v59 = vmul.f32 -0.5, %v836_v50  ;;  %v416_v2 = vand.u32 2147483647, %v836_v50 }
 0x105   : > { %v838_v52 = vpop.eup %837 }
 0x106   : > { %v401_v53 = vadd.f32 1.0, %v838_v52  ;;  %843 = vlog2.f32 %v410_v51  ;;  %v404_v58 = vmul.f32 -0.5, %v838_v52  ;;  %v407_v62 = vand.u32 2147483647, %v838_v52 }
 0x107   : > { %v840_v54 = vpop.eup %839  ;;  %v414_v0 = vadd.f32 1.0, %v413_v59  ;;  %vm417_vm2 = vcmp.lt.f32.partialorder %v416_v2, 0.0004427343 }
 0x108   : > { %845 = vlog2.f32 %v401_v53  ;;  %v428_v55 = vadd.f32 1.0, %v840_v54  ;;  %v405_v60 = vadd.f32 1.0, %v404_v58  ;;  %v431_v3 = vmul.f32 -0.5, %v840_v54 }
 0x109   : > { %vm408_vm1 = vcmp.lt.f32.partialorder %v407_v62, 0.0004427343  ;;  %v415_v11 = vmul.f32 %v836_v50, %v414_v0  ;;  %v434_v16 = vand.u32 2147483647, %v840_v54 }
 0x10a   : > { %v842_v56 = vpop.eup %841  ;;  %847 = vlog2.f32 %v428_v55  ;;  %v406_v5 = vmul.f32 %v838_v52, %v405_v60  ;;  %v432_v13 = vadd.f32 1.0, %v431_v3 }
 0x10b   : > { %v419_v57 = vadd.f32 1.0, %v842_v56  ;;  %v422_v63 = vmul.f32 -0.5, %v842_v56  ;;  %v425_v10 = vand.u32 2147483647, %v842_v56  ;;  %vm435_vm4 = vcmp.lt.f32.partialorder %v434_v16, 0.0004427343 }
 0x10c   : > { %v433_v22 = vmul.f32 %v840_v54, %v432_v13 }
 0x10d   : > { %849 = vlog2.f32 %v419_v57  ;;  %v423_v7 = vadd.f32 1.0, %v422_v63  ;;  %vm426_vm3 = vcmp.lt.f32.partialorder %v425_v10, 0.0004427343 }
 0x10f   : > { %v424_v18 = vmul.f32 %v842_v56, %v423_v7 }
 0x113   : > { %v844_v61 = vpop.eup %843 }
 0x114   : > { %v412_v6 = vmul.f32 0.6931472, %v844_v61 }
 0x115   : > { %v846_v1 = vpop.eup %845 }
 0x116   : > { %v403_v4 = vmul.f32 0.6931472, %v846_v1  ;;  %v418_v15 = vsel %vm417_vm2, %v415_v11, %v412_v6 }
 0x117   : > { %v848_v8 = vpop.eup %847  ;;  %v438_v21 = vadd.f32 %v418_v15, %v382_v36 }
 0x118   : > { %v409_v9 = vsel %vm408_vm1, %v406_v5, %v403_v4  ;;  %v430_v19 = vmul.f32 0.6931472, %v848_v8 }
 0x119   : > { %v437_v12 = vadd.f32 %v409_v9, %v381_v35 }
 0x11a   : > { %v850_v14 = vpop.eup %849  ;;  %v436_v24 = vsel %vm435_vm4, %v433_v22, %v430_v19 }
 0x11b   : > { %562 = vperm.xlu0 %833, %v437_v12   ;;  %v421_v17 = vmul.f32 0.6931472, %v850_v14  ;;  %v440_v25 = vadd.f32 %v436_v24, %v384_v46 }
 0x11d   : > { %v427_v20 = vsel %vm426_vm3, %v424_v18, %v421_v17 }
 0x11e   : > { %v439_v23 = vadd.f32 %v427_v20, %v383_v44 }
 0x11f   : > { %567 = vperm.xlu0 %833, %v438_v21  }
 0x120   : > { %572 = vperm.xlu1 %834, %v439_v23  }
 0x124   : > { %577 = vperm.xlu1 %834, %v440_v25  }
 0x196   : > { %v563_v26 = vpop.permute.xlu0 %562 }
 0x19a   : > { %v568_v35 = vpop.permute.xlu0 %567 }
 0x19b   : > { %v573_v32 = vpop.permute.xlu1 %572 }
 0x19f   : > { %v578_v44 = vpop.permute.xlu1 %577 }
 0x1b5   : > { %v774_v29 = vpop.f32.mrf.mxu1 }
 0x1b6   : > { %v536_v30 = vadd.f32 %v774_v29, %v690_v28 }
 0x1b7   : > { %v530_v31 = vpop.f32.mrf.mxu1 }
 0x1b8   : > { %v557_v33 = vadd.f32 %v691_v27, %v536_v30  ;;  %v531_v34 = vadd.f32 %v690_v28, %v530_v31 }
 0x1b9   : > { %v777_v38 = vpop.f32.mrf.mxu1 }
 0x1ba   : > { %v581_v36 = vmul.f32 %v568_v35, %v557_v33  ;;  %v556_v37 = vadd.f32 %v691_v27, %v531_v34  ;;  %v546_v39 = vadd.f32 %v777_v38, %v690_v28 }
 0x1bb   : > { %v540_v41 = vpop.f32.mrf.mxu1 }
 0x1bc   : > { %585 = vst [vmem:[%s260_s29 + $0x8] sm:$0xff] %v581_v36  ;;  %v580_v40 = vmul.f32 %v563_v26, %v556_v37  ;;  %v559_v42 = vadd.f32 %v691_v27, %v546_v39  ;;  %v541_v43 = vadd.f32 %v690_v28, %v540_v41 }
 0x1be   : > { %584 = vst [vmem:[%s260_s29] sm:$0xff] %v580_v40  ;;  %v583_v45 = vmul.f32 %v578_v44, %v559_v42  ;;  %v558_v46 = vadd.f32 %v691_v27, %v541_v43 }
 0x1c0   : > { %587 = vst [vmem:[%s260_s29 + $0x18] sm:$0xff] %v583_v45  ;;  %v582_v47 = vmul.f32 %v573_v32, %v558_v46 }
 0x1c2   : > { %586 = vst [vmem:[%s260_s29 + $0x10] sm:$0xff] %v582_v47 }
 0x1c3   : > { %890 = shalt.err (!%p887_p0)
}
 0x1c4   : > { %s891_s17 = scalar_lea.hbm %s1107_s13, 512  ;;  %s895_s26 = scalar_lea.hbm %s1157_s6, 1024 }
 0x1c5   : > { %p892_p1 = scmp.ne.s32.totalorder %s1107_s13, %s891_s17  ;;  %p896_p4 = scmp.lt.s32.totalorder %s1107_s13, %s1157_s6 }
 0x1c6   : > { %p897_p7 = scmp.lt.s32.totalorder %s895_s26, %s891_s17 }
 0x1c7   : > { %p893_p2 = pnand %p892_p1, %p1023_p5 }
 0x1c8   : > { %p898_p8 = por %p897_p7, %p896_p4 }
 0x1c9   : > { %p894_p3 = pneg %p893_p2 }
 0x1cb   : > { %p899_p6 = pnand %p898_p8, %p894_p3 }
 0x1cd   : > { %902 = shalt.err (!%p899_p6)
}
 0x1ce   : > { %s948_s10 = smov 128   ;;  %s949_s11 = smov 8  }
 0x1cf   : > { %782 = dma.vmem_to_hbm [thread:$0]  (%p1023_p5), %s1102_s9, 512, %s1107_s13, %s1111_s14, %s948_s10, %s948_s10, %s949_s11  }
 0x1d0 PF: > { %p794_p9 = scmp.ge.s32.totalorder %s941_s24, 2  ;;  %s617_s12 = sand.u32 1, %s929_s21  }
 0x1d1   : > { %p1161_p10 = scmp.ne.s32.totalorder %s1159_s8, 0  ;;  %s618_s15 = scalar_lea.sflag [#allocation4], %s617_s12 }
 0x1d3   : > { %p789_p11 = pnand %p794_p9, %p1161_p10 }
 0x1d5   : > { %p790_p12 = pneg %p789_p11 }
 0x1d7   : > { %924 = dma.done.wait (%p790_p12), %s618_s15, 512  }
 0x1d8   : > { %926 = vsyncadd (%p790_p12), %s618_s15, 4294966784  ;;  %p17_p13 = scmp.ge.s32.totalorder %s1010_s27, 4   ;;  %s1162_s21 = smov %s933_s22 }
 0x1d9   : > { %s1163_s22 = smov %s937_s23  ;;  %s1164_s23 = smov %s1021_s30 }
 0x1da   : > { %s1165_s24 = smov %s1010_s27  ;;  %19 = sbr.rel (!%p17_p13) target bundleno = 4 (0x4), region = 84 }
 0x1df   :  { %623 = vsyncpa [#allocation3], 1 }
 0x1e0   :  { %625 = vsyncpa [#allocation3 + $0x1], 1 }
 0x1e1   :  { %626 = vsyncpa [#allocation4], 1 }
 0x1e2   :  { %628 = vsyncpa [#allocation4 + $0x1], 1 }

</bundles_post_ra>
